<compile_context>
chip_gen: v6e
topology: v6e:2x2x1
jax: 0.10.0
libtpu: 0.0.40
codegen_flags: <defaults>
</compile_context>

<pallas_src>
from functools import lru_cache

import numpy as np
import jax
import jax.numpy as jnp
from jax.experimental import pallas as pl
from jax.experimental.pallas import tpu as pltpu


def _make_gc2gc_kernel(in_gamma: float, out_gamma: float, k_pad: int):
    """Build the kernel body; gammas and spectral width are compile-time constants."""
    need_imag = (out_gamma == 0.0)

    def _stage_in(re, im):
        # sC1 = (in_gamma * C1 + 1) ** (1 / in_gamma)   (or cexp(C1) for gamma == 0)
        if in_gamma == 0.0:
            mag = jnp.exp(re)
            return mag * jnp.cos(im), mag * jnp.sin(im)
        if in_gamma == 1.0:
            return re + 1.0, im
        if in_gamma == -1.0:
            wr = 1.0 - re
            wi = -im
            inv = 1.0 / (wr * wr + wi * wi)
            return wr * inv, -wi * inv
        if in_gamma == 0.5:
            wr = 0.5 * re + 1.0
            wi = 0.5 * im
            return wr * wr - wi * wi, 2.0 * wr * wi
        if in_gamma == -0.5:
            wr = 1.0 - 0.5 * re
            wi = -0.5 * im
            inv = 1.0 / (wr * wr + wi * wi)
            zr = wr * inv
            zi = -wi * inv
            return zr * zr - zi * zi, 2.0 * zr * zi
        # generic: |w|^(1/g) * exp(i * angle(w)/g), with pow via exp/log (EUP path)
        wr = in_gamma * re + 1.0
        wi = in_gamma * im
        d = wr * wr + wi * wi
        r = jnp.exp((0.5 / in_gamma) * jnp.log(d))
        th = jnp.arctan2(wi, wr) * (1.0 / in_gamma)
        return r * jnp.cos(th), r * jnp.sin(th)

    def _stage_out(sr, si):
        # C2 = clog(sC1)                          if out_gamma == 0   (complex)
        # C2 = (|s|^g cos(g*angle(s)) - 1) / g    otherwise           (purely real)
        if out_gamma == 0.0:
            return 0.5 * jnp.log(sr * sr + si * si), jnp.arctan2(si, sr)
        if out_gamma == 1.0:
            return sr - 1.0, None
        if out_gamma == -1.0:
            return 1.0 - sr / (sr * sr + si * si), None
        if out_gamma == 0.5:
            # |s|^0.5 * cos(angle/2) == Re(sqrt(s)) == sqrt((|s| + sr) / 2)
            m = jnp.sqrt(sr * sr + si * si)
            return 2.0 * (jnp.sqrt(0.5 * (m + sr)) - 1.0), None
        if out_gamma == -0.5:
            # |s|^-0.5 * cos(angle/2) == sqrt((|s| + sr) / 2) / |s|
            m = jnp.sqrt(sr * sr + si * si)
            return 2.0 * (1.0 - jnp.sqrt(0.5 * (m + sr)) / m), None
        d = sr * sr + si * si
        r = jnp.exp((0.5 * out_gamma) * jnp.log(d))
        th = jnp.arctan2(si, sr) * out_gamma
        return (r * jnp.cos(th) - 1.0) * (1.0 / out_gamma), None

    def _body(c1_ref, fwd_ref, idft_cos_ref, idft_sin_ref, o_ref):
        c1 = c1_ref[...].astype(jnp.float32)                       # (bm, M1+1)

        # Fused half-spectrum forward DFT: one matmul -> [Re | Im] of C1
        # (the c01 zero-tap mask is folded into the basis, row 0 == 0).
        spec = jnp.dot(c1, fwd_ref[...], preferred_element_type=jnp.float32)  # (bm, 2*k_pad)
        C1_re = spec[:, :k_pad]
        C1_im = spec[:, k_pad:]

        s_re, s_im = _stage_in(C1_re, C1_im)
        C2_re, C2_im = _stage_out(s_re, s_im)

        # Half-spectrum inverse DFT (Hermitian weights, 1/N and final 2x folded into basis)
        c02 = jnp.dot(C2_re, idft_cos_ref[...], preferred_element_type=jnp.float32)
        if idft_sin_ref is not None:
            c02 = c02 - jnp.dot(C2_im, idft_sin_ref[...], preferred_element_type=jnp.float32)

        # c2 = cat(c1[..., :1], 2 * c02[..., 1:]) ; the 2x / zero-col-0 already in the basis
        col = jax.lax.broadcasted_iota(jnp.int32, c02.shape, 1)
        o_ref[...] = jnp.where(col == 0, c1[:, :1], c02).astype(o_ref.dtype)

    if need_imag:
        def kernel(c1_ref, fwd_ref, idft_cos_ref, idft_sin_ref, o_ref):
            _body(c1_ref, fwd_ref, idft_cos_ref, idft_sin_ref, o_ref)
    else:
        def kernel(c1_ref, fwd_ref, idft_cos_ref, o_ref):
            _body(c1_ref, fwd_ref, idft_cos_ref, None, o_ref)

    return kernel, need_imag


def _build_bases_np(in_order: int, out_order: int, n_fft: int):
    """Host-side (I)DFT half-spectrum basis matrices with all scalings folded in."""
    k_spec = n_fft // 2 + 1                                 # bins 0..N/2 (real-input FFT)
    k_pad = ((k_spec + 127) // 128) * 128                   # lane-aligned spectral width
    out_pad = ((out_order + 1 + 127) // 128) * 128          # lane-dense output width

    k_idx = np.arange(k_pad)
    k = k_idx.astype(np.float64)
    valid = (k_idx < k_spec).astype(np.float64)

    # Forward DFT (rows = cepstral tap n, cols = bin k); row 0 zeroed == c01 masking.
    n1 = np.arange(in_order + 1, dtype=np.float64)
    ang1 = 2.0 * np.pi * np.outer(n1, k) / n_fft
    cos1 = np.cos(ang1) * valid
    nsin1 = -np.sin(ang1) * valid
    cos1[0, :] = 0.0
    nsin1[0, :] = 0.0
    fwd = np.concatenate([cos1, nsin1], axis=1).astype(np.float32)     # (M1+1, 2*k_pad)

    # Inverse DFT: fold Hermitian weights w_k, 1/N, and the final 2x (cols >= 1).
    wk = np.full(k_pad, 2.0)
    wk[0] = 1.0
    if n_fft % 2 == 0 and n_fft // 2 < k_pad:
        wk[n_fft // 2] = 1.0
    wk = wk * valid / n_fft

    j_idx = np.arange(out_pad)
    j = j_idx.astype(np.float64)
    colscale = np.where(j_idx == 0, 0.0, 2.0)               # col 0 is patched with c1[..., 0]
    ang2 = 2.0 * np.pi * np.outer(k, j) / n_fft
    idft_cos = (np.cos(ang2) * wk[:, None] * colscale[None, :]).astype(np.float32)  # (k_pad, out_pad)
    idft_sin = (np.sin(ang2) * wk[:, None] * colscale[None, :]).astype(np.float32)  # (k_pad, out_pad)

    return fwd, idft_cos, idft_sin, k_pad, out_pad


@lru_cache(maxsize=None)
def _cached_bases(in_order: int, out_order: int, n_fft: int):
    """Device-resident, cached basis matrices (built once per configuration)."""
    fwd, idft_cos, idft_sin, k_pad, out_pad = _build_bases_np(in_order, out_order, n_fft)
    return jnp.asarray(fwd), jnp.asarray(idft_cos), jnp.asarray(idft_sin), k_pad, out_pad


def mgc2mgc_pallas(c1, in_order, out_order, in_gamma, out_gamma, n_fft=512, block_m=256):
    assert c1.shape[-1] == in_order + 1
    assert abs(in_gamma) <= 1 and abs(out_gamma) <= 1
    assert max(in_order, out_order) + 1 < n_fft

    in_gamma = float(in_gamma)
    out_gamma = float(out_gamma)

    leading = c1.shape[:-1]
    B = int(np.prod(leading)) if leading else 1
    x = jnp.asarray(c1, jnp.float32).reshape(B, in_order + 1)

    # Large batch tile to fill the MXU / amortize per-step overhead; clamp for tiny batches.
    bm = min(max(int(block_m), 8), max(8, ((B + 7) // 8) * 8))
    bm = ((bm + 7) // 8) * 8
    Bp = ((B + bm - 1) // bm) * bm
    if Bp != B:
        x = jnp.pad(x, ((0, Bp - B), (0, 0)))               # padded rows give benign finite values

    fwd, idft_cos, idft_sin, k_pad, out_pad = _cached_bases(in_order, out_order, n_fft)
    kernel, need_imag = _make_gc2gc_kernel(in_gamma, out_gamma, k_pad)

    in_specs = [
        pl.BlockSpec((bm, in_order + 1), lambda i: (i, 0)),
        # Constant basis matrices (index_map is constant; re-fetch is skipped across steps).
        pl.BlockSpec((in_order + 1, 2 * k_pad), lambda i: (0, 0)),
        pl.BlockSpec((k_pad, out_pad), lambda i: (0, 0)),
    ]
    operands = [x, fwd, idft_cos]
    if need_imag:
        in_specs.append(pl.BlockSpec((k_pad, out_pad), lambda i: (0, 0)))
        operands.append(idft_sin)

    out = pl.pallas_call(
        kernel,
        out_shape=jax.ShapeDtypeStruct((Bp, out_pad), jnp.float32),
        grid_spec=pltpu.PrefetchScalarGridSpec(
            num_scalar_prefetch=0,
            grid=(Bp // bm,),
            in_specs=in_specs,
            out_specs=pl.BlockSpec((bm, out_pad), lambda i: (i, 0)),
        ),
        compiler_params=pltpu.CompilerParams(
            dimension_semantics=("parallel",),
            vmem_limit_bytes=32 * 1024 * 1024,
        ),
    )(*operands)

    out = out[:B, : out_order + 1]
    return out.reshape(*leading, out_order + 1)


def mgc2mgc_ref(c1, in_order, out_order, in_gamma, out_gamma, n_fft=512):
    """Pure-JAX reference mirroring the PyTorch forward (full-spectrum jnp.fft)."""
    c1 = jnp.asarray(c1, jnp.float32)
    c01 = jnp.concatenate([jnp.zeros_like(c1[..., :1]), c1[..., 1:]], axis=-1)
    C1 = jnp.fft.fft(c01, n=n_fft)
    if in_gamma == 0:
        mag = jnp.exp(C1.real)
        sC1 = mag * jnp.cos(C1.imag) + 1j * (mag * jnp.sin(C1.imag))
    else:
        C1 = C1 * in_gamma + 1.0
        r = jnp.abs(C1) ** (1.0 / in_gamma)
        theta = jnp.angle(C1) / in_gamma
        sC1 = r * jnp.cos(theta) + 1j * (r * jnp.sin(theta))
    if out_gamma == 0:
        C2 = 0.5 * jnp.log(sC1.real ** 2 + sC1.imag ** 2) + 1j * jnp.arctan2(sC1.imag, sC1.real)
    else:
        r = jnp.abs(sC1) ** out_gamma
        theta = jnp.angle(sC1) * out_gamma
        C2 = ((r * jnp.cos(theta) - 1.0) / out_gamma).astype(jnp.complex64)
    c02 = jnp.fft.ifft(C2)[..., : out_order + 1].real
    return jnp.concatenate([c1[..., :1], 2.0 * c02[..., 1:]], axis=-1)


if __name__ == "__main__":
    # Small shapes consistent with the module: batch=2, frames=8, in_order=8, out_order=10.
    in_order, out_order, n_fft = 8, 10, 512

    key = jax.random.PRNGKey(0)
    c1 = 0.1 * jax.random.normal(key, (2, 8, in_order + 1), dtype=jnp.float32)

    # Exercise every specialized path (in/out gamma in {0, +-1, +-0.5}), a zero-imag
    # output path (out != 0, no idft_sin input), and the fully generic fallback.
    configs = [
        (-0.5, 0.0),   # specialized in, complex-log out (imag IDFT branch)
        (0.0, -1.0),   # cexp in, specialized real out
        (1.0, 0.5),    # linear in, sqrt-based out
        (-1.0, -0.5),  # inverse in, rsqrt-based out
        (0.5, 1.0),    # square in, linear out
        (0.4, -0.3),   # fully generic fallback (exp/log/atan2 path)
    ]
    for in_gamma, out_gamma in configs:
        c2 = mgc2mgc_pallas(c1, in_order, out_order, in_gamma, out_gamma, n_fft=n_fft)
        c2 = jax.block_until_ready(c2)
        c2_ref = jax.block_until_ready(
            mgc2mgc_ref(c1, in_order, out_order, in_gamma, out_gamma, n_fft=n_fft)
        )
        assert c2.shape == (2, 8, out_order + 1), c2.shape
        err = float(jnp.max(jnp.abs(c2 - c2_ref)))
        assert jnp.allclose(c2, c2_ref, rtol=1e-3, atol=5e-4), (in_gamma, out_gamma, err)

    print("KERNEL_OK")
</pallas_src>

<mosaic_0001>
module attributes {stable_mosaic.version = 11 : i64} {
  func.func @kernel(%arg0: i32, %arg1: memref<16x9xf32, #tpu.memory_space<vmem>>, %arg2: memref<9x768xf32, #tpu.memory_space<vmem>>, %arg3: memref<384x128xf32, #tpu.memory_space<vmem>>, %arg4: memref<384x128xf32, #tpu.memory_space<vmem>>, %arg5: memref<16x128xf32, #tpu.memory_space<vmem>>) attributes {dimension_semantics = [#tpu.dimension_semantics<parallel>], iteration_bounds = array<i64: 1>, scalar_prefetch = 0 : i64, scratch_operands = 0 : i64, tpu.core_type = #tpu.core_type<tc>, window_params = [{transform_indices = @transform_0, window_bounds = array<i64: 16, 9>}, {pipeline_mode = #tpu.pipeline_mode<synchronous>, transform_indices = @transform_1, window_bounds = array<i64: 9, 768>}, {pipeline_mode = #tpu.pipeline_mode<synchronous>, transform_indices = @transform_2, window_bounds = array<i64: 384, 128>}, {pipeline_mode = #tpu.pipeline_mode<synchronous>, transform_indices = @transform_3, window_bounds = array<i64: 384, 128>}, {transform_indices = @transform_4, window_bounds = array<i64: 16, 128>}]} {
    %c0 = arith.constant 0 : index
    %c0_0 = arith.constant 0 : index
    %0 = vector.load %arg1[%c0, %c0_0] : memref<16x9xf32, #tpu.memory_space<vmem>>, vector<16x9xf32>
    %c0_1 = arith.constant 0 : index
    %c0_2 = arith.constant 0 : index
    %1 = vector.load %arg2[%c0_1, %c0_2] : memref<9x768xf32, #tpu.memory_space<vmem>>, vector<9x768xf32>
    %cst = arith.constant dense<0.000000e+00> : vector<16x768xf32>
    %2 = tpu.matmul %0, %1, %cst {dimension_numbers = #tpu.dot_dimension_numbers<[1], [0], [0], [1], [0, 0, 1, 1], [], []>} : vector<16x9xf32>, vector<9x768xf32>, vector<16x768xf32> -> vector<16x768xf32>
    %3 = vector.extract_strided_slice %2 {offsets = [0, 0], sizes = [16, 384], strides = [1, 1]} : vector<16x768xf32> to vector<16x384xf32>
    %4 = vector.extract_strided_slice %2 {offsets = [0, 384], sizes = [16, 384], strides = [1, 1]} : vector<16x768xf32> to vector<16x384xf32>
    %cst_3 = arith.constant 5.000000e-01 : f32
    %5 = vector.broadcast %cst_3 : f32 to vector<16x384xf32>
    %6 = arith.mulf %5, %3 : vector<16x384xf32>
    %cst_4 = arith.constant 1.000000e+00 : f32
    %7 = vector.broadcast %cst_4 : f32 to vector<16x384xf32>
    %8 = arith.subf %7, %6 : vector<16x384xf32>
    %cst_5 = arith.constant -5.000000e-01 : f32
    %9 = vector.broadcast %cst_5 : f32 to vector<16x384xf32>
    %10 = arith.mulf %9, %4 : vector<16x384xf32>
    %11 = arith.mulf %8, %8 : vector<16x384xf32>
    %12 = arith.mulf %10, %10 : vector<16x384xf32>
    %13 = arith.addf %11, %12 : vector<16x384xf32>
    %cst_6 = arith.constant 1.000000e+00 : f32
    %14 = vector.broadcast %cst_6 : f32 to vector<16x384xf32>
    %15 = arith.divf %14, %13 : vector<16x384xf32>
    %16 = arith.mulf %8, %15 : vector<16x384xf32>
    %cst_7 = arith.constant 0.000000e+00 : f32
    %17 = vector.broadcast %cst_7 : f32 to vector<16x384xf32>
    %18 = arith.subf %17, %10 : vector<16x384xf32>
    %19 = arith.mulf %18, %15 : vector<16x384xf32>
    %20 = arith.mulf %16, %16 : vector<16x384xf32>
    %21 = arith.mulf %19, %19 : vector<16x384xf32>
    %22 = arith.subf %20, %21 : vector<16x384xf32>
    %cst_8 = arith.constant 2.000000e+00 : f32
    %23 = vector.broadcast %cst_8 : f32 to vector<16x384xf32>
    %24 = arith.mulf %23, %16 : vector<16x384xf32>
    %25 = arith.mulf %24, %19 : vector<16x384xf32>
    %26 = arith.mulf %22, %22 : vector<16x384xf32>
    %27 = arith.mulf %25, %25 : vector<16x384xf32>
    %28 = arith.addf %26, %27 : vector<16x384xf32>
    %29 = math.log %28 : vector<16x384xf32>
    %cst_9 = arith.constant 5.000000e-01 : f32
    %30 = vector.broadcast %cst_9 : f32 to vector<16x384xf32>
    %31 = arith.mulf %30, %29 : vector<16x384xf32>
    %32 = math.atan2 %25, %22 : vector<16x384xf32>
    %c0_10 = arith.constant 0 : index
    %c0_11 = arith.constant 0 : index
    %33 = vector.load %arg3[%c0_10, %c0_11] : memref<384x128xf32, #tpu.memory_space<vmem>>, vector<384x128xf32>
    %cst_12 = arith.constant dense<0.000000e+00> : vector<16x128xf32>
    %34 = tpu.matmul %31, %33, %cst_12 {dimension_numbers = #tpu.dot_dimension_numbers<[1], [0], [0], [1], [0, 0, 1, 1], [], []>} : vector<16x384xf32>, vector<384x128xf32>, vector<16x128xf32> -> vector<16x128xf32>
    %c0_13 = arith.constant 0 : index
    %c0_14 = arith.constant 0 : index
    %35 = vector.load %arg4[%c0_13, %c0_14] : memref<384x128xf32, #tpu.memory_space<vmem>>, vector<384x128xf32>
    %cst_15 = arith.constant dense<0.000000e+00> : vector<16x128xf32>
    %36 = tpu.matmul %32, %35, %cst_15 {dimension_numbers = #tpu.dot_dimension_numbers<[1], [0], [0], [1], [0, 0, 1, 1], [], []>} : vector<16x384xf32>, vector<384x128xf32>, vector<16x128xf32> -> vector<16x128xf32>
    %37 = arith.subf %34, %36 : vector<16x128xf32>
    %38 = tpu.iota {dimensions = array<i32: 1>} : vector<16x128xi32>
    %c0_i32 = arith.constant 0 : i32
    %39 = vector.broadcast %c0_i32 : i32 to vector<16x128xi32>
    %40 = arith.cmpi eq, %38, %39 : vector<16x128xi32>
    %41 = vector.extract_strided_slice %0 {offsets = [0, 0], sizes = [16, 1], strides = [1, 1]} : vector<16x9xf32> to vector<16x1xf32>
    %42 = vector.shape_cast %41 : vector<16x1xf32> to vector<16x1xf32>
    %43 = vector.broadcast %42 : vector<16x1xf32> to vector<16x128xf32>
    %44 = arith.select %40, %43, %37 : vector<16x128xi1>, vector<16x128xf32>
    %c0_16 = arith.constant 0 : index
    %c0_17 = arith.constant 0 : index
    %45 = vector.load %arg5[%c0_16, %c0_17] : memref<16x128xf32, #tpu.memory_space<vmem>>, vector<16x128xf32>
    tpu.vector_store %arg5[%c0_16, %c0_17], %44 {strides = array<i32>} : memref<16x128xf32, #tpu.memory_space<vmem>>, vector<16x128xf32>,
    return
  }
  func.func @transform_0(%arg0: i32) -> (i32, i32) {
    %c0_i32 = arith.constant 0 : i32
    %c0_i32_0 = arith.constant 0 : i32
    return %arg0, %c0_i32 : i32, i32
  }
  func.func @transform_1(%arg0: i32) -> (i32, i32) {
    %c0_i32 = arith.constant 0 : i32
    %c0_i32_0 = arith.constant 0 : i32
    %c0_i32_1 = arith.constant 0 : i32
    return %c0_i32, %c0_i32_0 : i32, i32
  }
  func.func @transform_2(%arg0: i32) -> (i32, i32) {
    %c0_i32 = arith.constant 0 : i32
    %c0_i32_0 = arith.constant 0 : i32
    %c0_i32_1 = arith.constant 0 : i32
    return %c0_i32, %c0_i32_0 : i32, i32
  }
  func.func @transform_3(%arg0: i32) -> (i32, i32) {
    %c0_i32 = arith.constant 0 : i32
    %c0_i32_0 = arith.constant 0 : i32
    %c0_i32_1 = arith.constant 0 : i32
    return %c0_i32, %c0_i32_0 : i32, i32
  }
  func.func @transform_4(%arg0: i32) -> (i32, i32) {
    %c0_i32 = arith.constant 0 : i32
    %c0_i32_0 = arith.constant 0 : i32
    return %arg0, %c0_i32 : i32, i32
  }
}

</mosaic_0001>

<bundles_post_ra>
// kernel: tpu_custom_call.1
= control target key start
LH: loop header
LB: loop body
LE: loop exit
PB: predicated region body
PF: predicated region fallthrough
CT: control target
= control target key end

     0   :  { %9 = vsyncpa [#allocation3], 0  ;;  %s2018_s0 = inlined_call_operand.hbm [shape: f32[16,9], index: 0, kind: input, shape index: {}]   ;;  %s2019_s1 = inlined_call_operand.hbm [shape: f32[9,768], index: 1, kind: input, shape index: {}]   ;;  %s2020_s2 = inlined_call_operand.hbm [shape: f32[384,128], index: 2, kind: input, shape index: {}]   ;;  %s2021_s3 = inlined_call_operand.hbm [shape: f32[384,128], index: 3, kind: input, shape index: {}]   ;;  %s2022_s4 = inlined_call_operand.hbm [shape: f32[16,128], index: 4, kind: output, shape index: {}]  }
   0x1   :  { %10 = vsyncpa [#allocation6], 0 }
   0x2   :  { %11 = vsyncpa [#allocation9], 0 }
   0x3   :  { %12 = vsyncpa [#allocation4], 0  ;;  %s1541_s15 = smov [#allocation5]  }
   0x4   :  { %s30_s16 = sshll.u32 %s1541_s15, 4  ;;  %s31_s16 = int_to_ptr.vmem [resolvable:$true] %s30_s16 }
   0x5   :  { %s1441_s17 = scalar_lea.vmem %s31_s16, 1536  ;;  %p1446_p1 = scmp.lt.s32.totalorder %s31_s16, %s31_s16 }
   0x6   :  { %p1442_p0 = scmp.ne.s32.totalorder %s31_s16, %s1441_s17  ;;  %p1447_p2 = scmp.lt.s32.totalorder %s1441_s17, %s1441_s17 }
   0x8   :  { %p1448_p3 = por %p1447_p2, %p1446_p1 }
   0xa   :  { %p1449_p4 = pnand %p1448_p3, %p1442_p0 }
   0xc   :  { %1452 = shalt.err (!%p1449_p4)
}
   0xd   :  { %s1542_s18 = smov 768   ;;  %s1543_s19 = smov 48  }
   0xe   :  { %36 = dma.hbm_to_vmem [thread:$0]  %s2019_s1, 1536, %s31_s16, [#allocation6], %s1542_s18, %s1542_s18, %s1543_s19  }
   0xf   :  { %s1544_s22 = smov [#allocation2]  }
  0x10   :  { %s18_s23 = sshll.u32 %s1544_s22, 4  ;;  %s19_s23 = int_to_ptr.vmem [resolvable:$true] %s18_s23 }
  0x11   :  { %s1461_s24 = scalar_lea.vmem %s19_s23, 256  ;;  %p1466_p6 = scmp.lt.s32.totalorder %s19_s23, %s19_s23 }
  0x12   :  { %p1462_p5 = scmp.ne.s32.totalorder %s19_s23, %s1461_s24  ;;  %p1467_p7 = scmp.lt.s32.totalorder %s1461_s24, %s1461_s24 }
  0x14   :  { %p1468_p8 = por %p1467_p7, %p1466_p6 }
  0x16   :  { %p1469_p9 = pnand %p1468_p8, %p1462_p5 }
  0x18   :  { %1472 = shalt.err (!%p1469_p9)
}
  0x19   :  { %s1545_s25 = smov 128   ;;  %s1546_s26 = smov 8  }
  0x1a   :  { %24 = dma.hbm_to_vmem [thread:$0]  %s2018_s0, 256, %s19_s23, [#allocation3], %s1545_s25, %s1545_s25, %s1546_s26  }
  0x1b   :  { %s1547_s1 = smov [#allocation7]   ;;  %s1548_s30 = smov [#allocation8]  }
  0x1c   :  { %s42_s29 = sshll.u32 %s1547_s1, 4  ;;  %s54_s5 = sshll.u32 %s1548_s30, 4  ;;  %s43_s29 = int_to_ptr.vmem [resolvable:$true] %s42_s29  ;;  %s55_s5 = int_to_ptr.vmem [resolvable:$true] %s54_s5 }
  0x1d   :  { %s1481_s6 = scalar_lea.vmem %s43_s29, 6144  ;;  %p1486_p11 = scmp.lt.s32.totalorder %s43_s29, %s43_s29 }
  0x1e   :  { %p1482_p10 = scmp.ne.s32.totalorder %s43_s29, %s1481_s6  ;;  %p1487_p12 = scmp.lt.s32.totalorder %s1481_s6, %s1481_s6 }
  0x20   :  { %p1488_p13 = por %p1487_p12, %p1486_p11 }
  0x22   :  { %p1489_p0 = pnand %p1488_p13, %p1482_p10 }
  0x24   :  { %1492 = shalt.err (!%p1489_p0)
}
  0x25   :  { %48 = dma.hbm_to_vmem [thread:$0]  %s2020_s2, 6144, %s43_s29, [#allocation6], %s1545_s25, %s1545_s25, %s1546_s26  }
  0x26   :  { %s1501_s0 = scalar_lea.vmem %s55_s5, 6144  ;;  %p1506_p2 = scmp.lt.s32.totalorder %s55_s5, %s55_s5 }
  0x27   :  { %p1502_p1 = scmp.ne.s32.totalorder %s55_s5, %s1501_s0  ;;  %p1507_p3 = scmp.lt.s32.totalorder %s1501_s0, %s1501_s0 }
  0x29   :  { %p1508_p4 = por %p1507_p3, %p1506_p2 }
  0x2b   :  { %p1509_p5 = pnand %p1508_p4, %p1502_p1 }
  0x2d   :  { %1512 = shalt.err (!%p1509_p5)
}
  0x2e   :  { %60 = dma.hbm_to_vmem [thread:$0]  %s2021_s3, 6144, %s55_s5, [#allocation9], %s1545_s25, %s1545_s25, %s1546_s26  }
  0x2f   :  { %1533 = dma.done.wait [#allocation3], 256  }
  0x30   :  { %1534 = vsyncadd [#allocation3], 4294967040 }
  0x31   :  { %1535 = dma.done.wait [#allocation6], 7680  }
  0x32   :  { %1536 = vsyncadd [#allocation6], 4294959616 }
  0x33   :  { %1537 = dma.done.wait [#allocation9], 6144  }
  0x34   :  { %1538 = vsyncadd [#allocation9], 4294961152  ;;  %v1549_v0 = vmov 0.0   ;;  %vm94_vm0 = vcmask 1040384   ;;  %v82_v1 = vld [vmem:[#allocation5 + $0x38] sm:$0x1] }
  0x35   :  { %177 = vmatprep.mubr.f32.mxu0 %v1549_v0  ;;  %254 = vmatprep.mubr.f32.mxu1 %v1549_v0  ;;  %v84_v2 = vld [vmem:[#allocation5 + $0x48] sm:$0x1]  ;;  %v81_v3 = vld [vmem:[#allocation5 + $0x30] sm:$0x1]  ;;  %v83_v4 = vld [vmem:[#allocation5 + $0x40] sm:$0x1] }
  0x36   :  { %1190 = vmatprep.subr.msk.mxu0 %vm94_vm0, %v82_v1  ;;  %1194 = vmatprep.subr.msk.mxu1 %vm94_vm0, %v84_v2  ;;  %v76_v5 = vld [vmem:[#allocation5 + $0x8] sm:$0xff]  ;;  %v78_v6 = vld [vmem:[#allocation5 + $0x18] sm:$0xff]  ;;  %v75_v7 = vld [vmem:[#allocation5] sm:$0xff]  ;;  %vm87_vm1 = vcmask 72704   ;;  %s1552_s2 = smov [#allocation10]  }
  0x37   :  { %1191 = vmatpush1.msk.msra.mxu0 %vm94_vm0, %v81_v3  ;;  %1195 = vmatpush1.msk.msra.mxu1 %vm94_vm0, %v83_v4  ;;  %v77_v8 = vld [vmem:[#allocation5 + $0x10] sm:$0xff]  ;;  %v86_v10 = vld [vmem:[#allocation5 + $0x58] sm:$0x1]  ;;  %v80_v12 = vld [vmem:[#allocation5 + $0x28] sm:$0xff]  ;;  %s1176_s3 = sshll.u32 %s1552_s2, 4  ;;  %s1177_s3 = int_to_ptr.vmem [resolvable:$true] %s1176_s3 }
  0x38   :  { %v1605_v9 = vld [vmem:[#allocation2] sm:$0xff]  ;;  %143 = vmatprep.subr.mxu0 %v76_v5  ;;  %220 = vmatprep.subr.mxu1 %v78_v6  ;;  %v1613_v13 = vld [vmem:[#allocation2 + $0x8] sm:$0xff]  ;;  %v79_v14 = vld [vmem:[#allocation5 + $0x20] sm:$0xff]  ;;  %s1513_s11 = scalar_lea.vmem %s1177_s3, 256  ;;  %p1518_p7 = scmp.lt.s32.totalorder %s1177_s3, %s1177_s3 }
  0x39   :  { %144 = vmatpush1.msra.mxu0 %v75_v7  ;;  %221 = vmatpush1.msra.mxu1 %v77_v8  ;;  %v85_v11 = vld [vmem:[#allocation5 + $0x50] sm:$0x1]  ;;  %v789_v15 = vld [vmem:[#allocation7 + $0xf8] sm:$0xff]  ;;  %v787_v19 = vld [vmem:[#allocation7 + $0xe8] sm:$0xff]  ;;  %p1514_p6 = scmp.ne.s32.totalorder %s1177_s3, %s1513_s11  ;;  %p1519_p8 = scmp.lt.s32.totalorder %s1513_s11, %s1513_s11 }
  0x3a   :  { %1192 = vmatmul.mubr.msk.f32.vlgmr.msra.gmra.mxu0 %vm87_vm1, %v1605_v9  ;;  %1196 = vmatmul.mubr.msk.f32.vlgmr.msra.gmra.mxu1 %vm87_vm1, %v1605_v9  ;;  %v773_v16 = vld [vmem:[#allocation7 + $0x78] sm:$0xff]  ;;  %v788_v17 = vld [vmem:[#allocation7 + $0xf0] sm:$0xff]  ;;  %v771_v20 = vld [vmem:[#allocation7 + $0x68] sm:$0xff] }
  0x3b   :  { %1198 = vmatprep.subr.msk.mxu0 %vm94_vm0, %v86_v10  ;;  %183 = vmatprep.mubr.f32.mxu0 %v1549_v0  ;;  %v772_v18 = vld [vmem:[#allocation7 + $0x70] sm:$0xff]  ;;  %v805_v21 = vld [vmem:[#allocation7 + $0x178] sm:$0xff]  ;;  %v786_v22 = vld [vmem:[#allocation7 + $0xe0] sm:$0xff]  ;;  %p1520_p9 = por %p1519_p8, %p1518_p7 }
  0x3c   :  { %1199 = vmatpush1.msk.msra.mxu0 %vm94_vm0, %v85_v11  ;;  %260 = vmatprep.mubr.f32.mxu1 %v1549_v0  ;;  %v770_v23 = vld [vmem:[#allocation7 + $0x60] sm:$0xff]  ;;  %v804_v24 = vld [vmem:[#allocation7 + $0x170] sm:$0xff]  ;;  %v785_v25 = vld [vmem:[#allocation7 + $0xd8] sm:$0xff] }
  0x3d   :  { %297 = vmatprep.subr.mxu0 %v80_v12  ;;  %1202 = vmatprep.subr.mxu1 %v789_v15  ;;  %v769_v26 = vld [vmem:[#allocation7 + $0x58] sm:$0xff]  ;;  %v803_v27 = vld [vmem:[#allocation7 + $0x168] sm:$0xff]  ;;  %v784_v28 = vld [vmem:[#allocation7 + $0xd0] sm:$0xff]  ;;  %p1521_p10 = pnand %p1520_p9, %p1514_p6 }
  0x3e   :  { %1193 = vmatmul.mubr.msk.f32.gmra.mxu0 %vm87_vm1, %v1613_v13  ;;  %1197 = vmatmul.mubr.msk.f32.gmra.mxu1 %vm87_vm1, %v1613_v13  ;;  %v768_v29 = vld [vmem:[#allocation7 + $0x50] sm:$0xff]  ;;  %v802_v30 = vld [vmem:[#allocation7 + $0x160] sm:$0xff]  ;;  %v783_v31 = vld [vmem:[#allocation7 + $0xc8] sm:$0xff] }
  0x3f   :  { %298 = vmatpush1.msra.mxu0 %v79_v14  ;;  %331 = vmatprep.mubr.f32.mxu0 %v1549_v0  ;;  %v767_v32 = vld [vmem:[#allocation7 + $0x48] sm:$0xff]  ;;  %v801_v33 = vld [vmem:[#allocation7 + $0x158] sm:$0xff]  ;;  %v782_v34 = vld [vmem:[#allocation7 + $0xc0] sm:$0xff] }
  0x40   :  { %1203 = vmatpush3.msra.mxu1 %v773_v16  ;;  %1314 = vmatprep.subr.mxu0 %v805_v21  ;;  %v766_v35 = vld [vmem:[#allocation7 + $0x40] sm:$0xff]  ;;  %v800_v36 = vld [vmem:[#allocation7 + $0x150] sm:$0xff]  ;;  %v781_v37 = vld [vmem:[#allocation7 + $0xb8] sm:$0xff] }
  0x41   :  { %1204 = vmatprep.subr.mxu1 %v788_v17  ;;  %v765_v38 = vld [vmem:[#allocation7 + $0x38] sm:$0xff]  ;;  %v799_v39 = vld [vmem:[#allocation7 + $0x148] sm:$0xff]  ;;  %v780_v40 = vld [vmem:[#allocation7 + $0xb0] sm:$0xff] }
  0x42   :  { %1200 = vmatmul.mubr.msk.f32.vlgmr.msra.gmra.mxu0 %vm87_vm1, %v1605_v9  ;;  %1205 = vmatpush3.msra.mxu1 %v772_v18  ;;  %v764_v41 = vld [vmem:[#allocation7 + $0x30] sm:$0xff]  ;;  %v798_v42 = vld [vmem:[#allocation7 + $0x140] sm:$0xff]  ;;  %v779_v43 = vld [vmem:[#allocation7 + $0xa8] sm:$0xff] }
  0x43   :  { %337 = vmatprep.mubr.f32.mxu0 %v1549_v0  ;;  %1206 = vmatprep.subr.mxu1 %v787_v19  ;;  %v763_v44 = vld [vmem:[#allocation7 + $0x28] sm:$0xff]  ;;  %v797_v45 = vld [vmem:[#allocation7 + $0x138] sm:$0xff]  ;;  %v778_v46 = vld [vmem:[#allocation7 + $0xa0] sm:$0xff] }
  0x44   :  { %1207 = vmatpush3.msra.mxu1 %v771_v20  ;;  %1315 = vmatpush3.msra.mxu0 %v805_v21  ;;  %v762_v47 = vld [vmem:[#allocation7 + $0x20] sm:$0xff]  ;;  %v796_v48 = vld [vmem:[#allocation7 + $0x130] sm:$0xff]  ;;  %v777_v49 = vld [vmem:[#allocation7 + $0x98] sm:$0xff] }
  0x45   :  { %1208 = vmatprep.subr.mxu1 %v786_v22  ;;  %1316 = vmatprep.subr.mxu0 %v804_v24  ;;  %v761_v50 = vld [vmem:[#allocation7 + $0x18] sm:$0xff]  ;;  %v795_v51 = vld [vmem:[#allocation7 + $0x128] sm:$0xff]  ;;  %v776_v52 = vld [vmem:[#allocation7 + $0x90] sm:$0xff] }
  0x46   :  { %1201 = vmatmul.mubr.msk.f32.gmra.mxu0 %vm87_vm1, %v1613_v13  ;;  %1209 = vmatpush3.msra.mxu1 %v770_v23  ;;  %v760_v53 = vld [vmem:[#allocation7 + $0x10] sm:$0xff]  ;;  %v794_v54 = vld [vmem:[#allocation7 + $0x120] sm:$0xff]  ;;  %v775_v55 = vld [vmem:[#allocation7 + $0x88] sm:$0xff] }
  0x47   :  { %1210 = vmatprep.subr.mxu1 %v785_v25  ;;  %1317 = vmatpush3.msra.mxu0 %v804_v24  ;;  %v759_v56 = vld [vmem:[#allocation7 + $0x8] sm:$0xff]  ;;  %v793_v57 = vld [vmem:[#allocation7 + $0x118] sm:$0xff]  ;;  %v774_v58 = vld [vmem:[#allocation7 + $0x80] sm:$0xff] }
  0x48   :  { %1211 = vmatpush3.msra.mxu1 %v769_v26  ;;  %1318 = vmatprep.subr.mxu0 %v803_v27  ;;  %v758_v59 = vld [vmem:[#allocation7] sm:$0xff]  ;;  %v792_v60 = vld [vmem:[#allocation7 + $0x110] sm:$0xff]  ;;  %v791_v61 = vld [vmem:[#allocation7 + $0x108] sm:$0xff] }
  0x49   :  { %1212 = vmatprep.subr.mxu1 %v784_v28  ;;  %1319 = vmatpush3.msra.mxu0 %v803_v27  ;;  %v790_v62 = vld [vmem:[#allocation7 + $0x100] sm:$0xff]  ;;  %v987_v63 = vld [vmem:[#allocation8 + $0xf8] sm:$0xff] }
  0x4a   :  { %1213 = vmatpush3.msra.mxu1 %v768_v29  ;;  %1320 = vmatprep.subr.mxu0 %v802_v30  ;;  %v1627_v1 = vld [vmem:[#allocation8 + $0x178] sm:$0xff] }
  0x4b   :  { %1214 = vmatprep.subr.mxu1 %v783_v31  ;;  %1321 = vmatpush3.msra.mxu0 %v802_v30 }
  0x4c   :  { %1215 = vmatpush3.msra.mxu1 %v767_v32  ;;  %1322 = vmatprep.subr.mxu0 %v801_v33 }
  0x4d   :  { %1216 = vmatprep.subr.mxu1 %v782_v34  ;;  %1323 = vmatpush3.msra.mxu0 %v801_v33 }
  0x4e   :  { %1217 = vmatpush3.msra.mxu1 %v766_v35  ;;  %1324 = vmatprep.subr.mxu0 %v800_v36 }
  0x4f   :  { %1218 = vmatprep.subr.mxu1 %v781_v37  ;;  %1325 = vmatpush3.msra.mxu0 %v800_v36 }
  0x50   :  { %1219 = vmatpush3.msra.mxu1 %v765_v38  ;;  %1326 = vmatprep.subr.mxu0 %v799_v39 }
  0x51   :  { %1220 = vmatprep.subr.mxu1 %v780_v40  ;;  %1327 = vmatpush3.msra.mxu0 %v799_v39 }
  0x52   :  { %1221 = vmatpush3.msra.mxu1 %v764_v41  ;;  %1328 = vmatprep.subr.mxu0 %v798_v42 }
  0x53   :  { %1222 = vmatprep.subr.mxu1 %v779_v43  ;;  %1329 = vmatpush3.msra.mxu0 %v798_v42  ;;  %v1550_v42 = vmov 0  }
  0x54   :  { %1223 = vmatpush3.msra.mxu1 %v763_v44  ;;  %1330 = vmatprep.subr.mxu0 %v797_v45 }
  0x55   :  { %1224 = vmatprep.subr.mxu1 %v778_v46  ;;  %1331 = vmatpush3.msra.mxu0 %v797_v45 }
  0x56   :  { %1225 = vmatpush3.msra.mxu1 %v762_v47  ;;  %1332 = vmatprep.subr.mxu0 %v796_v48 }
  0x57   :  { %1226 = vmatprep.subr.mxu1 %v777_v49  ;;  %1333 = vmatpush3.msra.mxu0 %v796_v48 }
  0x58   :  { %1227 = vmatpush3.msra.mxu1 %v761_v50  ;;  %1334 = vmatprep.subr.mxu0 %v795_v51 }
  0x59   :  { %1228 = vmatprep.subr.mxu1 %v776_v52  ;;  %1335 = vmatpush3.msra.mxu0 %v795_v51 }
  0x5a   :  { %1229 = vmatpush3.msra.mxu1 %v760_v53  ;;  %1336 = vmatprep.subr.mxu0 %v794_v54 }
  0x5b   :  { %1230 = vmatprep.subr.mxu1 %v775_v55  ;;  %1337 = vmatpush3.msra.mxu0 %v794_v54 }
  0x5c   :  { %1231 = vmatpush3.msra.mxu1 %v759_v56  ;;  %1338 = vmatprep.subr.mxu0 %v793_v57 }
  0x5d   :  { %1232 = vmatprep.subr.mxu1 %v774_v58  ;;  %1339 = vmatpush3.msra.mxu0 %v793_v57 }
  0x5e   :  { %1233 = vmatpush3.msra.mxu1 %v758_v59  ;;  %1340 = vmatprep.subr.mxu0 %v792_v60 }
  0x5f   :  { %1341 = vmatpush3.msra.mxu0 %v792_v60  ;;  %1258 = vmatprep.subr.mxu1 %v987_v63 }
  0x60   :  { %1342 = vmatprep.subr.mxu0 %v791_v61  ;;  %1396 = vset.pattern.permute.xlu0 %v1550_v42 }
  0x61   :  { %1343 = vmatpush3.msra.mxu0 %v791_v61  ;;  %1160 = vperm.xlu0 %1396, %v1605_v9  }
  0x62   :  { %1344 = vmatprep.subr.mxu0 %v790_v62 }
  0x63   :  { %1345 = vmatpush3.msra.mxu0 %v790_v62 }
  0x64   :  { %1349 = vmatprep.subr.mxu0 %v1627_v1 }
  0x65   :  { %1164 = vperm.xlu0 %1396, %v1613_v13  }
  0xfa   :  { %v179_v2 = vpop.f32.mrf.mxu0  ;;  %v256_v3 = vpop.f32.mrf.mxu1 }
  0xfb   :  { %v344_v4 = vmul.f32 0.5, %v179_v2  ;;  %v346_v8 = vmul.f32 0.5, %v256_v3 }
  0xfc   :  { %v181_v5 = vpop.f32.mrf.mxu0  ;;  %v258_v6 = vpop.f32.mrf.mxu1 }
  0xfd   :  { %v350_v7 = vsub.f32 1.0, %v344_v4  ;;  %v356_v10 = vmul.f32 -0.5, %v258_v6  ;;  %v345_v11 = vmul.f32 0.5, %v181_v5  ;;  %v1630_v21 = vsub.f32 1.0, %v346_v8 }
  0xfe   :  { %v185_v12 = vpop.f32.mrf.mxu0  ;;  %v262_v14 = vpop.f32.mrf.mxu1 }
  0xff   :  { %v362_v15 = vmul.f32 %v350_v7, %v350_v7  ;;  %v368_v16 = vmul.f32 %v356_v10, %v356_v10  ;;  %v347_v17 = vmul.f32 0.5, %v185_v12  ;;  %v349_v18 = vmul.f32 0.5, %v262_v14 }
 0x100   :  { %v187_v19 = vpop.f32.mrf.mxu0  ;;  %v264_v20 = vpop.f32.mrf.mxu1  ;;  %v351_v25 = vsub.f32 1.0, %v345_v11  ;;  %v364_v33 = vmul.f32 %v1630_v21, %v1630_v21  ;;  %v398_v53 = vsub.f32 0.0, %v356_v10 }
 0x101   :  { %v374_v22 = vadd.f32 %v368_v16, %v362_v15  ;;  %v348_v23 = vmul.f32 0.5, %v187_v19  ;;  %v359_v24 = vmul.f32 -0.5, %v264_v20  ;;  %v353_v26 = vsub.f32 1.0, %v347_v17 }
 0x102   :  { %v333_v27 = vpop.f32.mrf.mxu0  ;;  %v1632_v30 = vsub.f32 1.0, %v349_v18  ;;  %v363_v36 = vmul.f32 %v351_v25, %v351_v25 }
 0x103   :  { %1397 = vrcp.f32 %v374_v22  ;;  %v371_v28 = vmul.f32 %v359_v24, %v359_v24  ;;  %v365_v29 = vmul.f32 %v353_v26, %v353_v26  ;;  %v357_v31 = vmul.f32 -0.5, %v333_v27 }
 0x104   :  { %v335_v32 = vpop.f32.mrf.mxu0  ;;  %v1636_v34 = vsub.f32 1.0, %v348_v23  ;;  %v367_v43 = vmul.f32 %v1632_v30, %v1632_v30  ;;  %v401_v59 = vsub.f32 0.0, %v359_v24 }
 0x105   :  { %v1638_v35 = vmul.f32 -0.5, %v335_v32  ;;  %v377_v37 = vadd.f32 %v371_v28, %v365_v29  ;;  %v369_v38 = vmul.f32 %v357_v31, %v357_v31  ;;  %v399_v3 = vsub.f32 0.0, %v357_v31 }
 0x106   :  { %v339_v39 = vpop.f32.mrf.mxu0  ;;  %v366_v46 = vmul.f32 %v1636_v34, %v1636_v34 }
 0x107   :  { %v370_v40 = vmul.f32 %v1638_v35, %v1638_v35  ;;  %v1642_v41 = vmul.f32 -0.5, %v339_v39  ;;  %1399 = vrcp.f32 %v377_v37  ;;  %v375_v44 = vadd.f32 %v369_v38, %v363_v36 }
 0x108   :  { %v341_v45 = vpop.f32.mrf.mxu0  ;;  %v400_v13 = vsub.f32 0.0, %v1638_v35 }
 0x109   :  { %v376_v47 = vadd.f32 %v370_v40, %v364_v33  ;;  %v372_v48 = vmul.f32 %v1642_v41, %v1642_v41  ;;  %v361_v49 = vmul.f32 -0.5, %v341_v45  ;;  %1401 = vrcp.f32 %v375_v44 }
 0x10b   :  { %1403 = vrcp.f32 %v376_v47  ;;  %v378_v50 = vadd.f32 %v372_v48, %v366_v46  ;;  %v373_v51 = vmul.f32 %v361_v49, %v361_v49  ;;  %v403_v8 = vsub.f32 0.0, %v361_v49 }
 0x10d   :  { %1405 = vrcp.f32 %v378_v50  ;;  %v379_v52 = vadd.f32 %v373_v51, %v367_v43 }
 0x10f   :  { %1407 = vrcp.f32 %v379_v52 }
 0x110   :  { %v1398_v54 = vpop.eup %1397 }
 0x111   :  { %v392_v9 = vmul.f32 %v1398_v54, %v350_v7  ;;  %v404_v55 = vmul.f32 %v1398_v54, %v398_v53  ;;  %v402_v7 = vsub.f32 0.0, %v1642_v41 }
 0x113   :  { %v410_v56 = vmul.f32 %v392_v9, %v392_v9  ;;  %v416_v57 = vmul.f32 %v404_v55, %v404_v55  ;;  %v428_v58 = vmul.f32 2.0, %v392_v9 }
 0x114   :  { %v1400_v60 = vpop.eup %1399 }
 0x115   :  { %v1652_v61 = vsub.f32 %v410_v56, %v416_v57  ;;  %v1654_v62 = vmul.f32 %v428_v58, %v404_v55  ;;  %v395_v63 = vmul.f32 %v1400_v60, %v353_v26  ;;  %v407_v2 = vmul.f32 %v1400_v60, %v401_v59 }
 0x116   :  { %v1402_v4 = vpop.eup %1401 }
 0x117   :  { %v1658_v5 = vand.u32 2147483647, %v1652_v61  ;;  %v1661_v6 = vand.u32 2147483647, %v1654_v62  ;;  %v413_v11 = vmul.f32 %v395_v63, %v395_v63  ;;  %v419_v12 = vmul.f32 %v407_v2, %v407_v2 }
 0x118   :  { %v1404_v10 = vpop.eup %1403  ;;  %v431_v14 = vmul.f32 2.0, %v395_v63  ;;  %v393_v15 = vmul.f32 %v1402_v4, %v351_v25  ;;  %v405_v17 = vmul.f32 %v1402_v4, %v399_v3  ;;  %v440_v19 = vmul.f32 %v1652_v61, %v1652_v61 }
 0x119   :  { %v479_v16 = vmax.f32 %v1658_v5, %v1661_v6  ;;  %v394_v18 = vmul.f32 %v1404_v10, %v1630_v21  ;;  %v1669_v22 = vsub.f32 %v413_v11, %v419_v12  ;;  %v406_v28 = vmul.f32 %v1404_v10, %v400_v13 }
 0x11a   :  { %v1406_v20 = vpop.eup %1405  ;;  %v1671_v23 = vmul.f32 %v431_v14, %v407_v2  ;;  %v411_v24 = vmul.f32 %v393_v15, %v393_v15  ;;  %v429_v26 = vmul.f32 2.0, %v393_v15  ;;  %v417_v27 = vmul.f32 %v405_v17, %v405_v17 }
 0x11b   :  { %1409 = vrcp.f32 %v479_v16  ;;  %v412_v25 = vmul.f32 %v394_v18, %v394_v18  ;;  %v430_v32 = vmul.f32 2.0, %v394_v18  ;;  %v396_v21 = vmul.f32 %v1406_v20, %v1636_v34 }
 0x11c   :  { %v1408_v29 = vpop.eup %1407  ;;  %v1673_v31 = vmul.f32 %v429_v26, %v405_v17  ;;  %v408_v33 = vmul.f32 %v1406_v20, %v402_v7  ;;  %v1676_v35 = vsub.f32 %v411_v24, %v417_v27  ;;  %v418_v36 = vmul.f32 %v406_v28, %v406_v28 }
 0x11d   :  { %v397_v37 = vmul.f32 %v1408_v29, %v1632_v30  ;;  %v409_v38 = vmul.f32 %v1408_v29, %v403_v8  ;;  %v1679_v39 = vmul.f32 %v430_v32, %v406_v28  ;;  %v414_v40 = vmul.f32 %v396_v21, %v396_v21 }
 0x11e   :  { %v420_v41 = vmul.f32 %v408_v33, %v408_v33  ;;  %v432_v42 = vmul.f32 2.0, %v396_v21  ;;  %v1681_v43 = vsub.f32 %v412_v25, %v418_v36  ;;  %v441_v48 = vmul.f32 %v1676_v35, %v1676_v35 }
 0x11f   :  { %v415_v44 = vmul.f32 %v397_v37, %v397_v37  ;;  %v421_v45 = vmul.f32 %v409_v38, %v409_v38  ;;  %v433_v46 = vmul.f32 2.0, %v397_v37  ;;  %v447_v30 = vmul.f32 %v1673_v31, %v1673_v31 }
 0x120   :  { %v1683_v47 = vsub.f32 %v414_v40, %v420_v41  ;;  %v1685_v34 = vmul.f32 %v432_v42, %v408_v33  ;;  %v446_v51 = vmul.f32 %v1654_v62, %v1654_v62  ;;  %v442_v52 = vmul.f32 %v1681_v43, %v1681_v43 }
 0x121   :  { %v1691_v49 = vsub.f32 %v415_v44, %v421_v45  ;;  %v1693_v50 = vmul.f32 %v433_v46, %v409_v38  ;;  %v453_v53 = vadd.f32 %v447_v30, %v441_v48  ;;  %v448_v54 = vmul.f32 %v1679_v39, %v1679_v39  ;;  %v971_v46 = vld [vmem:[#allocation8 + $0x78] sm:$0xff] }
 0x122   :  { %v444_v9 = vmul.f32 %v1683_v47, %v1683_v47  ;;  %v450_v55 = vmul.f32 %v1685_v34, %v1685_v34  ;;  %v452_v56 = vadd.f32 %v446_v51, %v440_v19  ;;  %v443_v57 = vmul.f32 %v1669_v22, %v1669_v22 }
 0x123   :  { %v449_v58 = vmul.f32 %v1671_v23, %v1671_v23  ;;  %1411 = vlog2.f32 %v453_v53  ;;  %v454_v59 = vadd.f32 %v448_v54, %v442_v52  ;;  %v445_v63 = vmul.f32 %v1691_v49, %v1691_v49  ;;  %v986_v53 = vld [vmem:[#allocation8 + $0xf0] sm:$0xff] }
 0x124   :  { %v456_v60 = vadd.f32 %v450_v55, %v444_v9  ;;  %1413 = vlog2.f32 %v452_v56  ;;  %v451_v3 = vmul.f32 %v1693_v50, %v1693_v50  ;;  %v1714_v13 = vand.u32 2147483647, %v1676_v35 }
 0x125   :  { %v455_v2 = vadd.f32 %v449_v58, %v443_v57  ;;  %1415 = vlog2.f32 %v454_v59  ;;  %v1717_v4 = vand.u32 2147483647, %v1673_v31  ;;  %v478_v7 = vmin.f32 %v1658_v5, %v1661_v6  ;;  %v970_v58 = vld [vmem:[#allocation8 + $0x70] sm:$0xff] }
 0x126   :  { %1417 = vlog2.f32 %v456_v60  ;;  %v457_v8 = vadd.f32 %v451_v3, %v445_v63  ;;  %vm557_vm2 = vcmp.ne.f32.partialorder %v1676_v35, %v1676_v35  ;;  %vm558_vm3 = vcmp.ne.f32.partialorder %v1673_v31, %v1673_v31  ;;  %v985_v3 = vld [vmem:[#allocation8 + $0xe8] sm:$0xff] }
 0x127   :  { %1419 = vlog2.f32 %v455_v2  ;;  %v526_v11 = vmax.f32 %v1714_v13, %v1717_v4  ;;  %vm1729_vm4 = vmor %vm557_vm2, %vm558_vm3  ;;  %vm510_vm5 = vcmp.ne.f32.partialorder %v1652_v61, %v1652_v61  ;;  %vm511_vm6 = vcmp.ne.f32.partialorder %v1654_v62, %v1654_v62 }
 0x128   :  { %v1410_v10 = vpop.eup %1409  ;;  %1421 = vlog2.f32 %v457_v8  ;;  %vm1742_vm7 = vmor %vm510_vm5, %vm511_vm6  ;;  %v1747_v18 = vand.u32 2147483647, %v1681_v43  ;;  %v1750_v19 = vand.u32 2147483647, %v1679_v39  ;;  %vm604_vm8 = vcmp.ne.f32.partialorder %v1681_v43, %v1681_v43  ;;  %v969_v8 = vld [vmem:[#allocation8 + $0x68] sm:$0xff] }
 0x129   :  { %v1723_v12 = vmul.f32 %v1410_v10, %v478_v7  ;;  %1423 = vrcp.f32 %v526_v11  ;;  %vm605_vm9 = vcmp.ne.f32.partialorder %v1679_v39, %v1679_v39  ;;  %v1764_v36 = vand.u32 2147483647, %v1683_v47  ;;  %v1002_v10 = vld [vmem:[#allocation8 + $0x170] sm:$0xff] }
 0x12a   :  { %v573_v24 = vmax.f32 %v1747_v18, %v1750_v19  ;;  %vm1759_vm10 = vmor %vm604_vm8, %vm605_vm9  ;;  %v1767_v41 = vand.u32 2147483647, %v1685_v34  ;;  %v525_v54 = vmin.f32 %v1714_v13, %v1717_v4  ;;  %vm698_vm11 = vcmp.ne.f32.partialorder %v1683_v47, %v1683_v47 }
 0x12b   :  { %v1735_v15 = vmul.f32 %v1723_v12, %v1723_v12  ;;  %vm699_vm12 = vcmp.ne.f32.partialorder %v1685_v34, %v1685_v34  ;;  %vm651_vm14 = vcmp.ne.f32.partialorder %v1669_v22, %v1669_v22  ;;  %vm652_vm15 = vcmp.ne.f32.partialorder %v1671_v23, %v1671_v23 }
 0x12c   :  { %1425 = vrcp.f32 %v573_v24  ;;  %v667_v9 = vmax.f32 %v1764_v36, %v1767_v41  ;;  %vm1788_vm13 = vmor %vm698_vm11, %vm699_vm12  ;;  %vm745_vm1 = vcmp.ne.f32.partialorder %v1691_v49, %v1691_v49  ;;  %vm746_vm2 = vcmp.ne.f32.partialorder %v1693_v50, %v1693_v50 }
 0x12d   :  { %v483_v16 = vmul.f32 0.002785687, %v1735_v15  ;;  %vm1809_vm0 = vmor %vm651_vm14, %vm652_vm15  ;;  %vm506_vm5 = vcmp.lt.s32.totalorder %v1652_v61, 0  ;;  %vm508_vm6 = vcmp.eq.f32.partialorder %v1654_v62, 0.0  ;;  %vm500_vm8 = vcmp.gt.f32.partialorder %v1661_v6, %v1658_v5 }
 0x12e   :  { %1427 = vrcp.f32 %v667_v9  ;;  %v981_v9 = vld [vmem:[#allocation8 + $0xc8] sm:$0xff]  ;;  %vm1838_vm3 = vmor %vm745_vm1, %vm746_vm2  ;;  %vm503_vm9 = vcmp.lt.f32.partialorder %v1652_v61, 0.0  ;;  %vm516_vm11 = vcmp.eq.s32.totalorder %v1658_v5, inf  ;;  %vm517_vm12 = vcmp.eq.s32.totalorder %v1661_v6, inf }
 0x12f   :  { %v484_v20 = vadd.f32 -0.015866, %v483_v16  ;;  %vm518_vm14 = vmand %vm516_vm11, %vm517_vm12  ;;  %vm547_vm15 = vcmp.gt.f32.partialorder %v1717_v4, %v1714_v13  ;;  %vm550_vm1 = vcmp.lt.f32.partialorder %v1676_v35, 0.0  ;;  %vm563_vm2 = vcmp.eq.s32.totalorder %v1714_v13, inf }
 0x130   :  { %v1412_v26 = vpop.eup %1411  ;;  %vm600_vm11 = vcmp.lt.s32.totalorder %v1681_v43, 0  ;;  %vm602_vm12 = vcmp.eq.f32.partialorder %v1679_v39, 0.0 }
 0x131   :  { %v485_v27 = vmul.f32 %v484_v20, %v1735_v15  ;;  %v1414_v28 = vpop.eup %1413  ;;  %v461_v25 = vmul.f32 0.6931472, %v1412_v26  ;;  %v984_v20 = vld [vmem:[#allocation8 + $0xe0] sm:$0xff]  ;;  %v1793_v26 = vand.u32 2147483647, %v1669_v22 }
 0x132   :  { %v1416_v32 = vpop.eup %1415  ;;  %v459_v21 = vmul.f32 0.6931472, %v1414_v28  ;;  %v1001_v28 = vld [vmem:[#allocation8 + $0x168] sm:$0xff] }
 0x133   :  { %v486_v33 = vadd.f32 0.04247222, %v485_v27  ;;  %v1418_v37 = vpop.eup %1417  ;;  %v471_v38 = vmul.f32 0.5, %v461_v25  ;;  %v463_v40 = vmul.f32 0.6931472, %v1416_v32  ;;  %v968_v27 = vld [vmem:[#allocation8 + $0x60] sm:$0xff] }
 0x134   :  { %v1420_v42 = vpop.eup %1419  ;;  %v470_v44 = vmul.f32 0.5, %v459_v21  ;;  %v467_v45 = vmul.f32 0.6931472, %v1418_v37  ;;  %v1798_v32 = vand.u32 2147483647, %v1671_v23  ;;  %v983_v21 = vld [vmem:[#allocation8 + $0xd8] sm:$0xff] }
 0x135   :  { %v487_v48 = vmul.f32 %v486_v33, %v1735_v15  ;;  %v1422_v30 = vpop.eup %1421  ;;  %870 = vmatprep.mubr.f32.mxu1 %v471_v38  ;;  %v472_v51 = vmul.f32 0.5, %v463_v40  ;;  %v465_v52 = vmul.f32 0.6931472, %v1420_v42  ;;  %v1000_v37 = vld [vmem:[#allocation8 + $0x160] sm:$0xff]  ;;  %v572_v40 = vmin.f32 %v1747_v18, %v1750_v19 }
 0x136   :  { %v1424_v55 = vpop.eup %1423  ;;  %871 = vmatmul.mubr.f32.vlgmr.msra.gmra.mxu1 %v470_v44  ;;  %v474_v56 = vmul.f32 0.5, %v467_v45  ;;  %v469_v57 = vmul.f32 0.6931472, %v1422_v30  ;;  %v620_v42 = vmax.f32 %v1793_v26, %v1798_v32 }
 0x137   :  { %v488_v59 = vadd.f32 -0.074975304, %v487_v48  ;;  %1346 = vmatprep.mubr.f32.mxu0 %v472_v51  ;;  %1259 = vmatpush3.msra.mxu1 %v971_v46  ;;  %v1776_v60 = vmul.f32 %v1424_v55, %v525_v54  ;;  %v473_v63 = vmul.f32 0.5, %v465_v52  ;;  %v1814_v46 = vand.u32 2147483647, %v1693_v50  ;;  %v982_v48 = vld [vmem:[#allocation8 + $0xd0] sm:$0xff] }
 0x138   :  { %875 = vmatprep.mubr.f32.mxu1 %v474_v56  ;;  %v475_v2 = vmul.f32 0.5, %v469_v57  ;;  %1260 = vmatprep.subr.mxu1 %v986_v53  ;;  %v966_v51 = vld [vmem:[#allocation8 + $0x50] sm:$0xff]  ;;  %v999_v52 = vld [vmem:[#allocation8 + $0x158] sm:$0xff]  ;;  %1429 = vrcp.f32 %v620_v42  ;;  %v1821_v56 = vand.u32 2147483647, %v1691_v49  ;;  %v965_v57 = vld [vmem:[#allocation8 + $0x48] sm:$0xff] }
 0x139   :  { %v489_v7 = vmul.f32 %v488_v59, %v1735_v15  ;;  %1261 = vmatpush3.msra.mxu1 %v970_v58  ;;  %v1783_v11 = vmul.f32 %v1776_v60, %v1776_v60  ;;  %v1426_v45 = vpop.eup %1425  ;;  %v998_v58 = vld [vmem:[#allocation8 + $0x150] sm:$0xff] }
 0x13a   :  { %876 = vmatmul.mubr.f32.gmra.mxu1 %v473_v63  ;;  %1347 = vmatmul.mubr.f32.vlgmr.msra.gmra.mxu0 %v475_v2  ;;  %v1817_v54 = vmul.f32 %v1426_v45, %v572_v40  ;;  %v980_v2 = vld [vmem:[#allocation8 + $0xc0] sm:$0xff]  ;;  %v978_v45 = vld [vmem:[#allocation8 + $0xb0] sm:$0xff] }
 0x13b   :  { %v490_v24 = vadd.f32 0.1064488, %v489_v7  ;;  %1262 = vmatprep.subr.mxu1 %v985_v3  ;;  %1350 = vmatpush3.msra.mxu0 %v1627_v1  ;;  %v530_v25 = vmul.f32 0.002785687, %v1783_v11  ;;  %v967_v1 = vld [vmem:[#allocation8 + $0x58] sm:$0xff]  ;;  %v666_v7 = vmin.f32 %v1764_v36, %v1767_v41 }
 0x13c   :  { %1263 = vmatpush3.msra.mxu1 %v969_v8  ;;  %1351 = vmatprep.subr.mxu0 %v1002_v10  ;;  %v1825_v63 = vmul.f32 %v1817_v54, %v1817_v54  ;;  %v714_v8 = vmax.f32 %v1821_v56, %v1814_v46 }
 0x13d   :  { %v491_v33 = vmul.f32 %v490_v24, %v1735_v15  ;;  %1264 = vmatprep.subr.mxu1 %v984_v20  ;;  %1352 = vmatpush3.msra.mxu0 %v1002_v10  ;;  %v531_v38 = vadd.f32 -0.015866, %v530_v25  ;;  %v964_v10 = vld [vmem:[#allocation8 + $0x40] sm:$0xff]  ;;  %v997_v20 = vld [vmem:[#allocation8 + $0x148] sm:$0xff]  ;;  %v979_v25 = vld [vmem:[#allocation8 + $0xb8] sm:$0xff] }
 0x13e   :  { %1265 = vmatpush3.msra.mxu1 %v968_v27  ;;  %1353 = vmatprep.subr.mxu0 %v1001_v28  ;;  %v577_v27 = vmul.f32 0.002785687, %v1825_v63  ;;  %1431 = vrcp.f32 %v714_v8  ;;  %v976_v8 = vld [vmem:[#allocation8 + $0xa0] sm:$0xff] }
 0x13f   :  { %v492_v30 = vadd.f32 -0.14207031, %v491_v33  ;;  %1266 = vmatprep.subr.mxu1 %v983_v21  ;;  %1354 = vmatpush3.msra.mxu0 %v1001_v28  ;;  %v532_v53 = vmul.f32 %v531_v38, %v1783_v11  ;;  %v1428_v28 = vpop.eup %1427 }
 0x140   :  { %1267 = vmatpush3.msra.mxu1 %v967_v1  ;;  %1355 = vmatprep.subr.mxu0 %v1000_v37  ;;  %v963_v1 = vld [vmem:[#allocation8 + $0x38] sm:$0xff]  ;;  %v578_v40 = vadd.f32 -0.015866, %v577_v27  ;;  %v1842_v42 = vmul.f32 %v1428_v28, %v666_v7 }
 0x141   :  { %v493_v55 = vmul.f32 %v492_v30, %v1735_v15  ;;  %1268 = vmatprep.subr.mxu1 %v982_v48  ;;  %1356 = vmatpush3.msra.mxu0 %v1000_v37  ;;  %v533_v59 = vadd.f32 0.04247222, %v532_v53  ;;  %v996_v37 = vld [vmem:[#allocation8 + $0x140] sm:$0xff]  ;;  %v962_v30 = vld [vmem:[#allocation8 + $0x30] sm:$0xff] }
 0x142   :  { %1269 = vmatpush3.msra.mxu1 %v966_v51  ;;  %1357 = vmatprep.subr.mxu0 %v999_v52  ;;  %v995_v51 = vld [vmem:[#allocation8 + $0x138] sm:$0xff]  ;;  %v579_v53 = vmul.f32 %v578_v40, %v1825_v63  ;;  %v992_v40 = vld [vmem:[#allocation8 + $0x120] sm:$0xff] }
 0x143   :  { %v494_v3 = vadd.f32 0.19993454, %v493_v55  ;;  %1270 = vmatprep.subr.mxu1 %v981_v9  ;;  %1358 = vmatpush3.msra.mxu0 %v999_v52  ;;  %v534_v24 = vmul.f32 %v533_v59, %v1783_v11  ;;  %v1848_v9 = vmul.f32 %v1842_v42, %v1842_v42  ;;  %v977_v55 = vld [vmem:[#allocation8 + $0xa8] sm:$0xff] }
 0x144   :  { %1271 = vmatpush3.msra.mxu1 %v965_v57  ;;  %1359 = vmatprep.subr.mxu0 %v998_v58  ;;  %v961_v57 = vld [vmem:[#allocation8 + $0x28] sm:$0xff] }
 0x145   :  { %v495_v21 = vmul.f32 %v494_v3, %v1735_v15  ;;  %1272 = vmatprep.subr.mxu1 %v980_v2  ;;  %1360 = vmatpush3.msra.mxu0 %v998_v58  ;;  %v535_v38 = vadd.f32 -0.074975304, %v534_v24  ;;  %v994_v58 = vld [vmem:[#allocation8 + $0x130] sm:$0xff]  ;;  %v580_v3 = vadd.f32 0.04247222, %v579_v53  ;;  %v993_v24 = vld [vmem:[#allocation8 + $0x128] sm:$0xff] }
 0x146   :  { %1273 = vmatpush3.msra.mxu1 %v964_v10  ;;  %1361 = vmatprep.subr.mxu0 %v997_v20  ;;  %v671_v7 = vmul.f32 0.002785687, %v1848_v9  ;;  %v958_v53 = vld [vmem:[#allocation8 + $0x10] sm:$0xff] }
 0x147   :  { %v496_v48 = vadd.f32 -0.33333147, %v495_v21  ;;  %1274 = vmatprep.subr.mxu1 %v979_v25  ;;  %1362 = vmatpush3.msra.mxu0 %v997_v20  ;;  %v536_v52 = vmul.f32 %v535_v38, %v1783_v11  ;;  %v960_v20 = vld [vmem:[#allocation8 + $0x20] sm:$0xff]  ;;  %v581_v28 = vmul.f32 %v580_v3, %v1825_v63  ;;  %v619_v25 = vmin.f32 %v1793_v26, %v1798_v32  ;;  %v1430_v21 = vpop.eup %1429  ;;  %v959_v38 = vld [vmem:[#allocation8 + $0x18] sm:$0xff]  ;;  %v973_v3 = vld [vmem:[#allocation8 + $0x88] sm:$0xff] }
 0x148   :  { %1275 = vmatpush3.msra.mxu1 %v963_v1  ;;  %1363 = vmatprep.subr.mxu0 %v996_v37  ;;  %v975_v1 = vld [vmem:[#allocation8 + $0x98] sm:$0xff] }
 0x149   :  { %v497_v59 = vmul.f32 %v496_v48, %v1735_v15  ;;  %1276 = vmatprep.subr.mxu1 %v978_v45  ;;  %1364 = vmatpush3.msra.mxu0 %v996_v37  ;;  %v537_v2 = vadd.f32 0.1064488, %v536_v52  ;;  %v672_v15 = vadd.f32 -0.015866, %v671_v7  ;;  %v582_v48 = vadd.f32 -0.074975304, %v581_v28 }
 0x14a   :  { %1277 = vmatpush3.msra.mxu1 %v962_v30  ;;  %1365 = vmatprep.subr.mxu0 %v995_v51  ;;  %v974_v52 = vld [vmem:[#allocation8 + $0x90] sm:$0xff]  ;;  %v957_v7 = vld [vmem:[#allocation8 + $0x8] sm:$0xff] }
 0x14b   :  { %v498_v10 = vmul.f32 %v497_v59, %v1723_v12  ;;  %1278 = vmatprep.subr.mxu1 %v977_v55  ;;  %1366 = vmatpush3.msra.mxu0 %v995_v51  ;;  %v538_v27 = vmul.f32 %v537_v2, %v1783_v11  ;;  %v673_v30 = vmul.f32 %v672_v15, %v1848_v9  ;;  %v991_v55 = vld [vmem:[#allocation8 + $0x118] sm:$0xff] }
 0x14c   :  { %1279 = vmatpush3.msra.mxu1 %v961_v57  ;;  %1367 = vmatprep.subr.mxu0 %v994_v58  ;;  %v1860_v51 = vmul.f32 %v1430_v21, %v619_v25 }
 0x14d   :  { %v499_v37 = vadd.f32 %v498_v10, %v1723_v12  ;;  %1280 = vmatprep.subr.mxu1 %v976_v8  ;;  %1368 = vmatpush3.msra.mxu0 %v994_v58  ;;  %v539_v45 = vadd.f32 -0.14207031, %v538_v27  ;;  %v583_v58 = vmul.f32 %v582_v48, %v1825_v63  ;;  %v674_v59 = vadd.f32 0.04247222, %v673_v30  ;;  %v990_v8 = vld [vmem:[#allocation8 + $0x110] sm:$0xff]  ;;  %v1432_v27 = vpop.eup %1431  ;;  %v989_v30 = vld [vmem:[#allocation8 + $0x108] sm:$0xff] }
 0x14e   :  { %1281 = vmatpush3.msra.mxu1 %v960_v20  ;;  %1369 = vmatprep.subr.mxu0 %v993_v24  ;;  %v1869_v2 = vmul.f32 %v1860_v51, %v1860_v51  ;;  %v507_v20 = vsel %vm506_vm5, 3.1415927, %v1549_v0  ;;  %vm564_vm5 = vcmp.eq.s32.totalorder %v1717_v4, inf }
 0x14f   :  { %v501_v12 = vsub.f32 1.5707964, %v499_v37  ;;  %1282 = vmatprep.subr.mxu1 %v975_v1  ;;  %1370 = vmatpush3.msra.mxu0 %v993_v24  ;;  %v540_v57 = vmul.f32 %v539_v45, %v1783_v11  ;;  %v713_v24 = vmin.f32 %v1821_v56, %v1814_v46  ;;  %v584_v25 = vadd.f32 0.1064488, %v583_v58  ;;  %v972_v1 = vld [vmem:[#allocation8 + $0x80] sm:$0xff] }
 0x150   :  { %1283 = vmatpush3.msra.mxu1 %v959_v38  ;;  %1371 = vmatprep.subr.mxu0 %v992_v40  ;;  %v675_v21 = vmul.f32 %v674_v59, %v1848_v9  ;;  %v956_v45 = vld [vmem:[#allocation8] sm:$0xff] }
 0x151   :  { %v502_v10 = vsel %vm500_vm8, %v501_v12, %v499_v37  ;;  %1284 = vmatprep.subr.mxu1 %v974_v52  ;;  %1372 = vmatpush3.msra.mxu0 %v992_v40  ;;  %v541_v28 = vadd.f32 0.19993454, %v540_v57  ;;  %v624_v37 = vmul.f32 0.002785687, %v1869_v2  ;;  %v1881_v38 = vmul.f32 %v1432_v27, %v713_v24  ;;  %vm565_vm8 = vmand %vm563_vm2, %vm564_vm5 }
 0x152   :  { %v504_v15 = vsub.f32 3.1415927, %v502_v10  ;;  %1285 = vmatpush3.msra.mxu1 %v958_v53  ;;  %1373 = vmatprep.subr.mxu0 %v991_v55  ;;  %v585_v52 = vmul.f32 %v584_v25, %v1825_v63  ;;  %v676_v12 = vadd.f32 -0.074975304, %v675_v21  ;;  %v1551_v57 = vmov 0.7853982  }
 0x153   :  { %1286 = vmatprep.subr.mxu1 %v973_v3  ;;  %1374 = vmatpush3.msra.mxu0 %v991_v55  ;;  %v542_v40 = vmul.f32 %v541_v28, %v1783_v11  ;;  %v515_v55 = vsel %vm503_vm9, 2.3561945, %v1551_v57  ;;  %v625_v58 = vadd.f32 -0.015866, %v624_v37  ;;  %v1894_v59 = vmul.f32 %v1881_v38, %v1881_v38 }
 0x154   :  { %v505_v48 = vsel %vm503_vm9, %v504_v15, %v502_v10  ;;  %1287 = vmatpush3.msra.mxu1 %v957_v7  ;;  %1375 = vmatprep.subr.mxu0 %v990_v8  ;;  %v586_v7 = vadd.f32 -0.14207031, %v585_v52  ;;  %v677_v61 = vmul.f32 %v676_v12, %v1848_v9  ;;  %v521_v27 = vand.u32 2147483648, %v1654_v62 }
 0x155   :  { %v509_v53 = vsel %vm508_vm6, %v507_v20, %v505_v48  ;;  %1288 = vmatprep.subr.mxu1 %v972_v1  ;;  %v543_v3 = vadd.f32 -0.33333147, %v542_v40  ;;  %1376 = vmatpush3.msra.mxu0 %v990_v8  ;;  %v988_v20 = vld [vmem:[#allocation8 + $0x100] sm:$0xff]  ;;  %v626_v28 = vmul.f32 %v625_v58, %v1869_v2  ;;  %v718_v17 = vmul.f32 0.002785687, %v1894_v59 }
 0x156   :  { %v513_v10 = vsel %vm1742_vm7, nan, %v509_v53  ;;  %1289 = vmatpush3.msra.mxu1 %v956_v45  ;;  %1377 = vmatprep.subr.mxu0 %v989_v30  ;;  %v587_v5 = vmul.f32 %v586_v7, %v1825_v63  ;;  %v678_v8 = vadd.f32 0.1064488, %v677_v61  ;;  %vm553_vm7 = vcmp.lt.s32.totalorder %v1676_v35, 0 }
 0x157   :  { %v519_v24 = vsel %vm518_vm14, %v515_v55, %v513_v10  ;;  %v544_v15 = vmul.f32 %v543_v3, %v1783_v11  ;;  %1378 = vmatpush3.msra.mxu0 %v989_v30  ;;  %v627_v25 = vadd.f32 0.04247222, %v626_v28  ;;  %v719_v21 = vadd.f32 -0.015866, %v718_v17 }
 0x158   :  { %v520_v6 = vand.u32 2147483647, %v519_v24  ;;  %1379 = vmatprep.subr.mxu0 %v988_v20  ;;  %v588_v62 = vadd.f32 0.19993454, %v587_v5  ;;  %v679_v45 = vmul.f32 %v678_v8, %v1848_v9  ;;  %v554_v61 = vsel %vm553_vm7, 3.1415927, %v1549_v0 }
 0x159   :  { %v545_v1 = vmul.f32 %v544_v15, %v1776_v60  ;;  %1380 = vmatpush3.msra.mxu0 %v988_v20  ;;  %v628_v40 = vmul.f32 %v627_v25, %v1869_v2  ;;  %v720_v11 = vmul.f32 %v719_v21, %v1894_v59  ;;  %vm555_vm6 = vcmp.eq.f32.partialorder %v1673_v31, 0.0 }
 0x15a   :  { %v1909_v37 = vor.u32 %v521_v27, %v520_v6  ;;  %v589_v30 = vmul.f32 %v588_v62, %v1825_v63  ;;  %v680_v52 = vadd.f32 -0.14207031, %v679_v45  ;;  %v562_v13 = vsel %vm550_vm1, 2.3561945, %v1551_v57 }
 0x15b   :  { %v546_v48 = vadd.f32 %v545_v1, %v1776_v60  ;;  %v629_v12 = vadd.f32 -0.074975304, %v628_v40  ;;  %v721_v53 = vadd.f32 0.04247222, %v720_v11  ;;  %v568_v11 = vand.u32 2147483648, %v1673_v31 }
 0x15c   :  { %v590_v58 = vadd.f32 -0.33333147, %v589_v30  ;;  %v681_v3 = vmul.f32 %v680_v52, %v1848_v9  ;;  %vm594_vm9 = vcmp.gt.f32.partialorder %v1750_v19, %v1747_v18  ;;  %vm610_vm14 = vcmp.eq.s32.totalorder %v1747_v18, inf }
 0x15d   :  { %v548_v55 = vsub.f32 1.5707964, %v546_v48  ;;  %v630_v10 = vmul.f32 %v629_v12, %v1869_v2  ;;  %v722_v60 = vmul.f32 %v721_v53, %v1894_v59  ;;  %vm611_vm7 = vcmp.eq.s32.totalorder %v1750_v19, inf }
 0x15e   :  { %v591_v20 = vmul.f32 %v590_v58, %v1825_v63  ;;  %v682_v24 = vadd.f32 0.19993454, %v681_v3  ;;  %vm688_vm2 = vcmp.gt.f32.partialorder %v1767_v41, %v1764_v36  ;;  %vm691_vm5 = vcmp.lt.f32.partialorder %v1683_v47, 0.0 }
 0x15f   :  { %v549_v7 = vsel %vm547_vm15, %v548_v55, %v546_v48  ;;  %v631_v28 = vadd.f32 0.1064488, %v630_v10  ;;  %v723_v17 = vadd.f32 -0.074975304, %v722_v60  ;;  %v601_v10 = vsel %vm600_vm11, 3.1415927, %v1549_v0 }
 0x160   :  { %v551_v27 = vsub.f32 3.1415927, %v549_v7  ;;  %v592_v15 = vmul.f32 %v591_v20, %v1817_v54  ;;  %v683_v6 = vmul.f32 %v682_v24, %v1848_v9  ;;  %vm694_vm15 = vcmp.lt.s32.totalorder %v1683_v47, 0 }
 0x161   :  { %v632_v8 = vmul.f32 %v631_v28, %v1869_v2  ;;  %v724_v63 = vmul.f32 %v723_v17, %v1894_v59  ;;  %v695_v29 = vsel %vm694_vm15, 3.1415927, %v1549_v0  ;;  %vm644_vm11 = vcmp.lt.f32.partialorder %v1669_v22, 0.0 }
 0x162   :  { %v552_v5 = vsel %vm550_vm1, %v551_v27, %v549_v7  ;;  %v593_v4 = vadd.f32 %v592_v15, %v1817_v54  ;;  %v684_v21 = vadd.f32 -0.33333147, %v683_v6  ;;  %vm612_vm1 = vmand %vm610_vm14, %vm611_vm7  ;;  %vm658_vm14 = vcmp.eq.s32.totalorder %v1798_v32, inf }
 0x163   :  { %v556_v25 = vsel %vm555_vm6, %v554_v61, %v552_v5  ;;  %v633_v62 = vadd.f32 -0.14207031, %v632_v8  ;;  %v725_v45 = vadd.f32 0.1064488, %v724_v63  ;;  %vm704_vm6 = vcmp.eq.s32.totalorder %v1764_v36, inf }
 0x164   :  { %v560_v1 = vsel %vm1729_vm4, nan, %v556_v25  ;;  %v595_v48 = vsub.f32 1.5707964, %v593_v4  ;;  %v685_v30 = vmul.f32 %v684_v21, %v1848_v9  ;;  %vm597_vm4 = vcmp.lt.f32.partialorder %v1681_v43, 0.0 }
 0x165   :  { %v566_v40 = vsel %vm565_vm8, %v562_v13, %v560_v1  ;;  %v634_v35 = vmul.f32 %v633_v62, %v1869_v2  ;;  %v726_v54 = vmul.f32 %v725_v45, %v1894_v59  ;;  %v609_v18 = vsel %vm597_vm4, 2.3561945, %v1551_v57 }
 0x166   :  { %v567_v52 = vand.u32 2147483647, %v566_v40  ;;  %v596_v12 = vsel %vm594_vm9, %v595_v48, %v593_v4  ;;  %v686_v14 = vmul.f32 %v685_v30, %v1842_v42  ;;  %vm705_vm8 = vcmp.eq.s32.totalorder %v1767_v41, inf }
 0x167   :  { %v598_v31 = vsub.f32 3.1415927, %v596_v12  ;;  %v635_v55 = vadd.f32 0.19993454, %v634_v35  ;;  %v727_v58 = vadd.f32 -0.14207031, %v726_v54  ;;  %vm706_vm9 = vmand %vm704_vm6, %vm705_vm8  ;;  %vm735_vm15 = vcmp.gt.f32.partialorder %v1814_v46, %v1821_v56 }
 0x168   :  { %v569_v53 = vor.u32 %v568_v11, %v567_v52  ;;  %v687_v9 = vadd.f32 %v686_v14, %v1842_v42  ;;  %v703_v13 = vsel %vm691_vm5, 2.3561945, %v1551_v57  ;;  %v709_v1 = vand.u32 2147483648, %v1685_v34 }
 0x169   :  { %v599_v3 = vsel %vm597_vm4, %v598_v31, %v596_v12  ;;  %v636_v60 = vmul.f32 %v635_v55, %v1869_v2  ;;  %v728_v7 = vmul.f32 %v727_v58, %v1894_v59  ;;  %vm641_vm4 = vcmp.gt.f32.partialorder %v1798_v32, %v1793_v26 }
 0x16a   :  { %1068 = vmatprep.mubr.f32.mxu1 %v569_v53  ;;  %v603_v61 = vsel %vm602_vm12, %v601_v10, %v599_v3  ;;  %v689_v19 = vsub.f32 1.5707964, %v687_v9  ;;  %vm657_vm12 = vcmp.eq.s32.totalorder %v1793_v26, inf  ;;  %vm649_vm7 = vcmp.eq.f32.partialorder %v1671_v23, 0.0 }
 0x16b   :  { %1069 = vmatmul.mubr.f32.vlgmr.msra.gmra.mxu1 %v1909_v37  ;;  %v607_v42 = vsel %vm1759_vm10, nan, %v603_v61  ;;  %v637_v20 = vadd.f32 -0.33333147, %v636_v60  ;;  %v729_v24 = vadd.f32 0.19993454, %v728_v7  ;;  %v615_v37 = vand.u32 2147483648, %v1679_v39 }
 0x16c   :  { %v613_v27 = vsel %vm612_vm1, %v609_v18, %v607_v42  ;;  %v690_v28 = vsel %vm688_vm2, %v689_v19, %v687_v9  ;;  %vm696_vm10 = vcmp.eq.f32.partialorder %v1685_v34, 0.0  ;;  %vm741_vm1 = vcmp.lt.s32.totalorder %v1691_v49, 0  ;;  %vm659_vm2 = vmand %vm657_vm12, %vm658_vm14  ;;  %v1161_v18 = vpop.permute.xlu0 %1160 }
 0x16d   :  { %v614_v43 = vand.u32 2147483647, %v613_v27  ;;  %v692_v17 = vsub.f32 3.1415927, %v690_v28  ;;  %v638_v15 = vmul.f32 %v637_v20, %v1869_v2  ;;  %v730_v6 = vmul.f32 %v729_v24, %v1894_v59 }
 0x16e   :  { %v656_v26 = vsel %vm644_vm11, 2.3561945, %v1551_v57  ;;  %v662_v32 = vand.u32 2147483648, %v1671_v23  ;;  %vm752_vm6 = vcmp.eq.s32.totalorder %v1814_v46, inf  ;;  %v742_v12 = vsel %vm741_vm1, 3.1415927, %v1549_v0 }
 0x16f   :  { %v616_v5 = vor.u32 %v615_v37, %v614_v43  ;;  %v693_v39 = vsel %vm691_vm5, %v692_v17, %v690_v28  ;;  %v639_v8 = vmul.f32 %v638_v15, %v1860_v51  ;;  %v731_v63 = vadd.f32 -0.33333147, %v730_v6 }
 0x170   :  { %v697_v25 = vsel %vm696_vm10, %v695_v29, %v693_v39  ;;  %vm738_vm5 = vcmp.lt.f32.partialorder %v1691_v49, 0.0  ;;  %vm751_vm10 = vcmp.eq.s32.totalorder %v1821_v56, inf  ;;  %vm743_vm8 = vcmp.eq.f32.partialorder %v1693_v50, 0.0  ;;  %v1165_v29 = vpop.permute.xlu0 %1164 }
 0x171   :  { %1381 = vmatprep.mubr.f32.mxu0 %v616_v5  ;;  %v701_v2 = vsel %vm1788_vm13, nan, %v697_v25  ;;  %v640_v36 = vadd.f32 %v639_v8, %v1860_v51  ;;  %v732_v41 = vmul.f32 %v731_v63, %v1894_v59  ;;  %vm647_vm13 = vcmp.lt.s32.totalorder %v1669_v22, 0 }
 0x172   :  { %v707_v4 = vsel %vm706_vm9, %v703_v13, %v701_v2  ;;  %v648_v59 = vsel %vm647_vm13, 3.1415927, %v1549_v0  ;;  %v750_v23 = vsel %vm738_vm5, 2.3561945, %v1551_v57  ;;  %v756_v56 = vand.u32 2147483648, %v1693_v50 }
 0x173   :  { %v708_v21 = vand.u32 2147483647, %v707_v4  ;;  %v642_v62 = vsub.f32 1.5707964, %v640_v36  ;;  %v733_v45 = vmul.f32 %v732_v41, %v1881_v38  ;;  %v1156_v7 = vlaneseq }
 0x175   :  { %v710_v16 = vor.u32 %v709_v1, %v708_v21  ;;  %v643_v40 = vsel %vm641_vm4, %v642_v62, %v640_v36  ;;  %v734_v47 = vadd.f32 %v733_v45, %v1881_v38  ;;  %v1157_v42 = vand.u32 127, %v1156_v7 }
 0x176   :  { %v645_v11 = vsub.f32 3.1415927, %v643_v40 }
 0x177   :  { %1073 = vmatprep.mubr.f32.mxu1 %v710_v16  ;;  %v736_v34 = vsub.f32 1.5707964, %v734_v47 }
 0x178   :  { %v646_v51 = vsel %vm644_vm11, %v645_v11, %v643_v40 }
 0x179   :  { %v650_v48 = vsel %vm649_vm7, %v648_v59, %v646_v51  ;;  %v737_v30 = vsel %vm735_vm15, %v736_v34, %v734_v47 }
 0x17a   :  { %v654_v22 = vsel %vm1809_vm0, nan, %v650_v48  ;;  %v739_v38 = vsub.f32 3.1415927, %v737_v30  ;;  %vm753_vm0 = vmand %vm751_vm10, %vm752_vm6 }
 0x17b   :  { %v660_v52 = vsel %vm659_vm2, %v656_v26, %v654_v22 }
 0x17c   :  { %v661_v35 = vand.u32 2147483647, %v660_v52  ;;  %v740_v54 = vsel %vm738_vm5, %v739_v38, %v737_v30 }
 0x17d   :  { %v744_v44 = vsel %vm743_vm8, %v742_v12, %v740_v54 }
 0x17e   :  { %v663_v14 = vor.u32 %v662_v32, %v661_v35  ;;  %v748_v53 = vsel %vm1838_vm3, nan, %v744_v44  ;;  %vm1158_vm3 = vcmp.eq.s32.totalorder %v1157_v42, 0 }
 0x17f   :  { %v754_v31 = vsel %vm753_vm0, %v750_v23, %v748_v53 }
 0x180   :  { %1074 = vmatmul.mubr.f32.gmra.mxu1 %v663_v14  ;;  %v755_v49 = vand.u32 2147483647, %v754_v31 }
 0x182   :  { %v757_v46 = vor.u32 %v756_v56, %v755_v49 }
 0x184   :  { %1382 = vmatmul.mubr.f32.vlgmr.msra.gmra.mxu0 %v757_v46 }
 0x1f6   :  { %v1234_v55 = vpop.f32.mrf.mxu1 }
 0x1f8   :  { %v1235_v58 = vpop.f32.mrf.mxu1 }
 0x1f9   :  { %v1236_v27 = vadd.f32 %v1235_v58, %v1234_v55 }
 0x1fa   :  { %v1237_v0 = vpop.f32.mrf.mxu1  ;;  %v1348_v60 = vpop.f32.mrf.mxu0 }
 0x1fc   :  { %v1238_v9 = vpop.f32.mrf.mxu1  ;;  %v947_v57 = vpop.f32.mrf.mxu0 }
 0x1fd   :  { %v1239_v61 = vadd.f32 %v1238_v9, %v1237_v0  ;;  %v948_v17 = vadd.f32 %v1236_v27, %v947_v57 }
 0x1ff   :  { %v953_v50 = vadd.f32 %v1348_v60, %v1239_v61 }
 0x22b   :  { %v1290_v3 = vpop.f32.mrf.mxu1 }
 0x22d   :  { %v1291_v10 = vpop.f32.mrf.mxu1 }
 0x22e   :  { %v1292_v37 = vadd.f32 %v1291_v10, %v1290_v3 }
 0x240   :  { %v1293_v33 = vpop.f32.mrf.mxu1 }
 0x242   :  { %v1294_v19 = vpop.f32.mrf.mxu1 }
 0x243   :  { %v1295_v20 = vadd.f32 %v1294_v19, %v1293_v33 }
 0x244   :  { %v1383_v24 = vpop.f32.mrf.mxu0 }
 0x245   :  { %v1151_v28 = vadd.f32 %v1383_v24, %v1295_v20 }
 0x246   :  { %v1145_v43 = vpop.f32.mrf.mxu0 }
 0x247   :  { %v1155_v15 = vsub.f32 %v953_v50, %v1151_v28  ;;  %v1146_v6 = vadd.f32 %v1292_v37, %v1145_v43 }
 0x249   :  { %v1154_v5 = vsub.f32 %v948_v17, %v1146_v6  ;;  %v1168_v39 = vsel %vm1158_vm3, %v1165_v29, %v1155_v15 }
 0x24a   :  { %1170 = vst [vmem:[#allocation10 + $0x8] sm:$0xff] %v1168_v39 }
 0x24b   :  { %v1167_v8 = vsel %vm1158_vm3, %v1161_v18, %v1154_v5 }
 0x24c   :  { %1169 = vst [vmem:[#allocation10] sm:$0xff] %v1167_v8 }
 0x24d   :  { %1524 = shalt.err (!%p1521_p10)
}
 0x24e   :  { %1182 = dma.vmem_to_hbm [thread:$0]  %s1177_s3, 256, %s2022_s4, [#allocation4], %s1545_s25, %s1545_s25, %s1546_s26  }
 0x24f   :  { %1539 = dma.done.wait [#allocation4], 256  }
 0x250   :  { %1540 = vsyncadd [#allocation4], 4294967040 }
 0x251   :  { %1186 = vsyncpa [#allocation3], 1 }
 0x252   :  { %1187 = vsyncpa [#allocation6], 1 }
 0x253   :  { %1188 = vsyncpa [#allocation9], 1 }
 0x254   :  { %1189 = vsyncpa [#allocation4], 1 }

</bundles_post_ra>
